<compile_context>
chip_gen: v5e
topology: v5e:2x2
jax: 0.10.0
libtpu: 0.0.40
codegen_flags: <defaults>
</compile_context>

<pallas_src>
import functools

import jax
import jax.numpy as jnp
from jax.experimental import pallas as pl
from jax.experimental.pallas import tpu as pltpu

EPS = 1e-5
HIDDEN = 32     # layers[0] == layers[1] == n_time_embedding == 32
LANES = 128     # 4 * HIDDEN == one full lane group


def _bn_cond_affine(h, gamma, beta):
    """BatchNorm1d (training batch stats, affine=False) + conditional affine.

    One-pass statistics: var = E[h^2] - mean^2 (h >= 0 post-ReLU, f32 is safe).
    """
    inv_b = 1.0 / h.shape[0]
    mean = jnp.sum(h, axis=0, keepdims=True) * inv_b
    ex2 = jnp.sum(h * h, axis=0, keepdims=True) * inv_b
    var = jnp.maximum(ex2 - mean * mean, 0.0)
    h_hat = (h - mean) * jax.lax.rsqrt(var + EPS)
    return gamma * h_hat + beta


def mlp_cnf_bn_kernel(z_ref, t_ref, sp_ref, wp_ref, out_ref, *, n_param_in):
    H = HIDDEN
    B = z_ref.shape[0]

    # ---- unpack the small-parameter tile (one (4+P, 128) VMEM tile) ----------
    sp = sp_ref[...]
    wt   = sp[0:1,         0:H]        # time-embedding weight (1, H)
    bt   = sp[0:1,       H:2 * H]      # time-embedding bias   (1, H)
    b0   = sp[0:1, 2 * H:3 * H]        # layer-0 bias          (1, H)
    b1   = sp[0:1, 3 * H:4 * H]        # layer-1 bias          (1, H)
    b_gb = sp[1:2, :]                  # [gb0 | bb0 | gb1 | bb1] (1, 4H)
    bout = sp[2:3, :]                  # output bias, zero-padded to 128 lanes

    # ---- time embedding: Linear(1 -> H) + relu (pure VPU, in_features == 1) --
    t_emb = jnp.maximum(t_ref[...] * wt + bt, 0.0)                    # (B, H)

    # ---- fused conditional affine: one lane-dense (B,H)@(H,4H) MXU push ------
    gb = jnp.dot(t_emb, wp_ref[:, 0:4 * H],
                 preferred_element_type=jnp.float32) + b_gb           # (B, 4H)
    gamma0, beta0 = gb[:,         0:H], gb[:,       H:2 * H]
    gamma1, beta1 = gb[:, 2 * H:3 * H], gb[:, 3 * H:4 * H]

    # ---- layer 0: Linear(P -> H) as P unrolled VPU FMAs (K=P too small) ------
    z = z_ref[...]                                                    # (B, P)
    acc = jnp.broadcast_to(b0, (B, H))
    for k in range(n_param_in):
        acc = acc + z[:, k:k + 1] * sp[4 + k:5 + k, 0:H]
    h = jnp.maximum(acc, 0.0)
    h = _bn_cond_affine(h, gamma0, beta0)
    # TODO(synk): dropout(p=0.1) reproduced as identity (eval semantics).

    # ---- layer 1: Linear(H -> H) ---------------------------------------------
    h = jnp.dot(h, wp_ref[:, 4 * H:5 * H],
                preferred_element_type=jnp.float32) + b1
    h = jnp.maximum(h, 0.0)
    h = _bn_cond_affine(h, gamma1, beta1)

    # ---- output: Linear(H -> P), padded to 128 cols for a lane-dense store ---
    out_ref[...] = jnp.dot(h, wp_ref[:, 2 * LANES:3 * LANES],
                           preferred_element_type=jnp.float32) + bout


# ------------------------------ parameters -----------------------------------

def _linear_params(key, fan_in, fan_out):
    """PyTorch nn.Linear default init: U(-1/sqrt(fan_in), 1/sqrt(fan_in)).

    Weight is returned already transposed to (fan_in, fan_out), bias as (1, fan_out).
    """
    kw, kb = jax.random.split(key)
    bound = 1.0 / (fan_in ** 0.5)
    w = jax.random.uniform(kw, (fan_in, fan_out), jnp.float32, -bound, bound)
    b = jax.random.uniform(kb, (1, fan_out), jnp.float32, -bound, bound)
    return w, b


def init_params(key, n_parameter_inputs, layers, n_time_embedding):
    assert len(layers) == 2, "fused kernel is specialized for 2 hidden layers"
    assert layers[0] == layers[1] == n_time_embedding == HIDDEN
    keys = jax.random.split(key, 9)
    params = {}
    params["wt"], params["bt"] = _linear_params(keys[0], 1, n_time_embedding)
    params["w0"], params["b0"] = _linear_params(keys[1], n_parameter_inputs, layers[0])
    params["gw0"], params["gb0"] = _linear_params(keys[2], n_time_embedding, layers[0])
    params["bw0"], params["bb0"] = _linear_params(keys[3], n_time_embedding, layers[0])
    params["w1"], params["b1"] = _linear_params(keys[4], layers[0], layers[1])
    params["gw1"], params["gb1"] = _linear_params(keys[5], layers[0], layers[1])
    params["bw1"], params["bb1"] = _linear_params(keys[6], layers[0], layers[1])
    params["wout"], params["bout"] = _linear_params(keys[7], layers[1], n_parameter_inputs)
    return params


def pack_params(params, n_parameter_inputs):
    """Pack all parameters into 2 lane-dense arrays consumed by the kernel."""
    P = n_parameter_inputs
    H = HIDDEN
    assert 4 * H == LANES

    # small-parameter pack: (4 + P, 128) == one padded VMEM tile for P == 4
    row0 = jnp.concatenate(
        [params["wt"], params["bt"], params["b0"], params["b1"]], axis=1)       # (1, 4H)
    row1 = jnp.concatenate(
        [params["gb0"], params["bb0"], params["gb1"], params["bb1"]], axis=1)   # (1, 4H)
    row2 = jnp.pad(params["bout"], ((0, 0), (0, LANES - P)))                    # (1, 128)
    row3 = jnp.zeros((1, LANES), jnp.float32)
    w0_rows = jnp.pad(params["w0"], ((0, 0), (0, LANES - H)))                   # (P, 128)
    sp = jnp.concatenate([row0, row1, row2, row3, w0_rows], axis=0)

    # weight pack: (H, 384) = [gw0|bw0|gw1|bw1] | [w1, 0-pad] | [wout, 0-pad]
    wgb = jnp.concatenate(
        [params["gw0"], params["bw0"], params["gw1"], params["bw1"]], axis=1)   # (H, 4H)
    w1p = jnp.pad(params["w1"], ((0, 0), (0, LANES - H)))                       # (H, 128)
    woutp = jnp.pad(params["wout"], ((0, 0), (0, LANES - P)))                   # (H, 128)
    wp = jnp.concatenate([wgb, w1p, woutp], axis=1)

    return {"sp": sp.astype(jnp.float32), "wp": wp.astype(jnp.float32)}


# ------------------------------- wrapper --------------------------------------

@jax.jit
def mlp_cnf_bn_forward(z, x, t, packed):
    """Fused forward. `x` is unused by the reference forward and is ignored."""
    del x
    B, P = z.shape
    t2 = t.reshape(-1, 1).astype(jnp.float32)                 # t.view(-1, 1)

    vmem = pl.BlockSpec(memory_space=pltpu.MemorySpace.VMEM)
    out_pad = pl.pallas_call(
        functools.partial(mlp_cnf_bn_kernel, n_param_in=P),
        out_shape=jax.ShapeDtypeStruct((B, LANES), jnp.float32),
        in_specs=[vmem, vmem, vmem, vmem],
        out_specs=vmem,
    )(z.astype(jnp.float32), t2, packed["sp"], packed["wp"])
    # Kernel stores a lane-dense (B, 128); cheap XLA slice back to (B, P).
    return out_pad[:, :P]


# ------------------------------ reference -------------------------------------

def reference_forward(z, x, t, params):
    """Pure-JAX reference with identical semantics (for verification)."""
    del x
    t2 = t.reshape(-1, 1).astype(jnp.float32)
    t_emb = jnp.maximum(t2 @ params["wt"] + params["bt"], 0.0)

    def block(z, w, b, gw, gb, bw, bb):
        h = jnp.maximum(z @ w + b, 0.0)
        mean = jnp.mean(h, axis=0, keepdims=True)
        var = jnp.mean((h - mean) ** 2, axis=0, keepdims=True)
        h_hat = (h - mean) / jnp.sqrt(var + EPS)
        return (t_emb @ gw + gb) * h_hat + (t_emb @ bw + bb)

    z = z.astype(jnp.float32)
    z = block(z, params["w0"], params["b0"], params["gw0"], params["gb0"],
              params["bw0"], params["bb0"])
    z = block(z, params["w1"], params["b1"], params["gw1"], params["gb1"],
              params["bw1"], params["bb1"])
    return z @ params["wout"] + params["bout"]


if __name__ == "__main__":
    # Small, module-consistent shapes.
    B = 8
    n_data_inputs = 6
    n_parameter_inputs = 4
    layers = [HIDDEN, HIDDEN]
    n_time_embedding = HIDDEN   # must equal layers[0] for the module to run

    key = jax.random.PRNGKey(0)
    kz, kx, kt, kp = jax.random.split(key, 4)
    z = jax.random.normal(kz, (B, n_parameter_inputs), jnp.float32)
    x = jax.random.normal(kx, (B, n_data_inputs), jnp.float32)   # unused by forward
    t = jax.random.uniform(kt, (B,), jnp.float32)

    params = init_params(kp, n_parameter_inputs, layers, n_time_embedding)
    packed = pack_params(params, n_parameter_inputs)

    out = mlp_cnf_bn_forward(z, x, t, packed)
    out = jax.block_until_ready(out)

    ref = reference_forward(z, x, t, params)
    assert out.shape == (B, n_parameter_inputs)
    assert jnp.allclose(out, ref, atol=1e-4, rtol=1e-4), "mismatch vs JAX reference"

    print("KERNEL_OK")
</pallas_src>

<mosaic_0001>
module attributes {stable_mosaic.version = 11 : i64} {
  func.func @mlp_cnf_bn_kernel(%arg0: memref<8x4xf32, #tpu.memory_space<vmem>>, %arg1: memref<8x1xf32, #tpu.memory_space<vmem>>, %arg2: memref<8x128xf32, #tpu.memory_space<vmem>>, %arg3: memref<32x384xf32, #tpu.memory_space<vmem>>, %arg4: memref<8x128xf32, #tpu.memory_space<vmem>>) attributes {dimension_semantics = [], scalar_prefetch = 0 : i64, scratch_operands = 0 : i64, tpu.core_type = #tpu.core_type<tc>} {
    %c0 = arith.constant 0 : index
    %c0_0 = arith.constant 0 : index
    %0 = vector.load %arg2[%c0, %c0_0] : memref<8x128xf32, #tpu.memory_space<vmem>>, vector<8x128xf32>
    %1 = vector.extract_strided_slice %0 {offsets = [0, 0], sizes = [1, 32], strides = [1, 1]} : vector<8x128xf32> to vector<1x32xf32>
    %2 = vector.extract_strided_slice %0 {offsets = [0, 32], sizes = [1, 32], strides = [1, 1]} : vector<8x128xf32> to vector<1x32xf32>
    %3 = vector.extract_strided_slice %0 {offsets = [0, 64], sizes = [1, 32], strides = [1, 1]} : vector<8x128xf32> to vector<1x32xf32>
    %4 = vector.extract_strided_slice %0 {offsets = [0, 96], sizes = [1, 32], strides = [1, 1]} : vector<8x128xf32> to vector<1x32xf32>
    %5 = vector.extract_strided_slice %0 {offsets = [1, 0], sizes = [1, 128], strides = [1, 1]} : vector<8x128xf32> to vector<1x128xf32>
    %6 = vector.extract_strided_slice %0 {offsets = [2, 0], sizes = [1, 128], strides = [1, 1]} : vector<8x128xf32> to vector<1x128xf32>
    %c0_1 = arith.constant 0 : index
    %c0_2 = arith.constant 0 : index
    %7 = vector.load %arg1[%c0_1, %c0_2] : memref<8x1xf32, #tpu.memory_space<vmem>>, vector<8x1xf32>
    %8 = vector.broadcast %7 : vector<8x1xf32> to vector<8x32xf32>
    %9 = vector.broadcast %1 : vector<1x32xf32> to vector<8x32xf32>
    %10 = arith.mulf %8, %9 : vector<8x32xf32>
    %11 = vector.broadcast %2 : vector<1x32xf32> to vector<8x32xf32>
    %12 = arith.addf %10, %11 : vector<8x32xf32>
    %cst = arith.constant 0.000000e+00 : f32
    %13 = vector.broadcast %cst : f32 to vector<8x32xf32>
    %14 = arith.maximumf %12, %13 : vector<8x32xf32>
    %c0_3 = arith.constant 0 : index
    %c0_4 = arith.constant 0 : index
    %15 = vector.load %arg3[%c0_3, %c0_4] : memref<32x384xf32, #tpu.memory_space<vmem>>, vector<32x128xf32>
    %cst_5 = arith.constant dense<0.000000e+00> : vector<8x128xf32>
    %16 = tpu.matmul %14, %15, %cst_5 {dimension_numbers = #tpu.dot_dimension_numbers<[1], [0], [0], [1], [0, 0, 1, 1], [], []>} : vector<8x32xf32>, vector<32x128xf32>, vector<8x128xf32> -> vector<8x128xf32>
    %17 = vector.broadcast %5 : vector<1x128xf32> to vector<8x128xf32>
    %18 = arith.addf %16, %17 : vector<8x128xf32>
    %19 = vector.extract_strided_slice %18 {offsets = [0, 0], sizes = [8, 32], strides = [1, 1]} : vector<8x128xf32> to vector<8x32xf32>
    %20 = vector.extract_strided_slice %18 {offsets = [0, 32], sizes = [8, 32], strides = [1, 1]} : vector<8x128xf32> to vector<8x32xf32>
    %21 = vector.extract_strided_slice %18 {offsets = [0, 64], sizes = [8, 32], strides = [1, 1]} : vector<8x128xf32> to vector<8x32xf32>
    %22 = vector.extract_strided_slice %18 {offsets = [0, 96], sizes = [8, 32], strides = [1, 1]} : vector<8x128xf32> to vector<8x32xf32>
    %c0_6 = arith.constant 0 : index
    %c0_7 = arith.constant 0 : index
    %23 = vector.load %arg0[%c0_6, %c0_7] : memref<8x4xf32, #tpu.memory_space<vmem>>, vector<8x4xf32>
    %24 = vector.shape_cast %3 : vector<1x32xf32> to vector<1x32xf32>
    %25 = vector.broadcast %24 : vector<1x32xf32> to vector<8x32xf32>
    %26 = vector.extract_strided_slice %23 {offsets = [0, 0], sizes = [8, 1], strides = [1, 1]} : vector<8x4xf32> to vector<8x1xf32>
    %27 = vector.extract_strided_slice %0 {offsets = [4, 0], sizes = [1, 32], strides = [1, 1]} : vector<8x128xf32> to vector<1x32xf32>
    %28 = vector.broadcast %26 : vector<8x1xf32> to vector<8x32xf32>
    %29 = vector.broadcast %27 : vector<1x32xf32> to vector<8x32xf32>
    %30 = arith.mulf %28, %29 : vector<8x32xf32>
    %31 = arith.addf %25, %30 : vector<8x32xf32>
    %32 = vector.extract_strided_slice %23 {offsets = [0, 1], sizes = [8, 1], strides = [1, 1]} : vector<8x4xf32> to vector<8x1xf32>
    %33 = vector.extract_strided_slice %0 {offsets = [5, 0], sizes = [1, 32], strides = [1, 1]} : vector<8x128xf32> to vector<1x32xf32>
    %34 = vector.broadcast %32 : vector<8x1xf32> to vector<8x32xf32>
    %35 = vector.broadcast %33 : vector<1x32xf32> to vector<8x32xf32>
    %36 = arith.mulf %34, %35 : vector<8x32xf32>
    %37 = arith.addf %31, %36 : vector<8x32xf32>
    %38 = vector.extract_strided_slice %23 {offsets = [0, 2], sizes = [8, 1], strides = [1, 1]} : vector<8x4xf32> to vector<8x1xf32>
    %39 = vector.extract_strided_slice %0 {offsets = [6, 0], sizes = [1, 32], strides = [1, 1]} : vector<8x128xf32> to vector<1x32xf32>
    %40 = vector.broadcast %38 : vector<8x1xf32> to vector<8x32xf32>
    %41 = vector.broadcast %39 : vector<1x32xf32> to vector<8x32xf32>
    %42 = arith.mulf %40, %41 : vector<8x32xf32>
    %43 = arith.addf %37, %42 : vector<8x32xf32>
    %44 = vector.extract_strided_slice %23 {offsets = [0, 3], sizes = [8, 1], strides = [1, 1]} : vector<8x4xf32> to vector<8x1xf32>
    %45 = vector.extract_strided_slice %0 {offsets = [7, 0], sizes = [1, 32], strides = [1, 1]} : vector<8x128xf32> to vector<1x32xf32>
    %46 = vector.broadcast %44 : vector<8x1xf32> to vector<8x32xf32>
    %47 = vector.broadcast %45 : vector<1x32xf32> to vector<8x32xf32>
    %48 = arith.mulf %46, %47 : vector<8x32xf32>
    %49 = arith.addf %43, %48 : vector<8x32xf32>
    %cst_8 = arith.constant 0.000000e+00 : f32
    %50 = vector.broadcast %cst_8 : f32 to vector<8x32xf32>
    %51 = arith.maximumf %49, %50 : vector<8x32xf32>
    %cst_9 = arith.constant dense<0.000000e+00> : vector<32xf32>
    %52 = vector.multi_reduction <add>, %51, %cst_9 [0] : vector<8x32xf32> to vector<32xf32>
    %53 = vector.shape_cast %52 : vector<32xf32> to vector<1x32xf32>
    %cst_10 = arith.constant 1.250000e-01 : f32
    %54 = vector.broadcast %cst_10 : f32 to vector<1x32xf32>
    %55 = arith.mulf %53, %54 : vector<1x32xf32>
    %56 = arith.mulf %51, %51 : vector<8x32xf32>
    %cst_11 = arith.constant dense<0.000000e+00> : vector<32xf32>
    %57 = vector.multi_reduction <add>, %56, %cst_11 [0] : vector<8x32xf32> to vector<32xf32>
    %58 = vector.shape_cast %57 : vector<32xf32> to vector<1x32xf32>
    %cst_12 = arith.constant 1.250000e-01 : f32
    %59 = vector.broadcast %cst_12 : f32 to vector<1x32xf32>
    %60 = arith.mulf %58, %59 : vector<1x32xf32>
    %61 = arith.mulf %55, %55 : vector<1x32xf32>
    %62 = arith.subf %60, %61 : vector<1x32xf32>
    %cst_13 = arith.constant 0.000000e+00 : f32
    %63 = vector.broadcast %cst_13 : f32 to vector<1x32xf32>
    %64 = arith.maximumf %62, %63 : vector<1x32xf32>
    %65 = vector.broadcast %55 : vector<1x32xf32> to vector<8x32xf32>
    %66 = arith.subf %51, %65 : vector<8x32xf32>
    %cst_14 = arith.constant 9.99999974E-6 : f32
    %67 = vector.broadcast %cst_14 : f32 to vector<1x32xf32>
    %68 = arith.addf %64, %67 : vector<1x32xf32>
    %69 = math.rsqrt %68 : vector<1x32xf32>
    %70 = vector.broadcast %69 : vector<1x32xf32> to vector<8x32xf32>
    %71 = arith.mulf %66, %70 : vector<8x32xf32>
    %72 = arith.mulf %19, %71 : vector<8x32xf32>
    %73 = arith.addf %72, %20 : vector<8x32xf32>
    %c0_15 = arith.constant 0 : index
    %c128 = arith.constant 128 : index
    %74 = vector.load %arg3[%c0_15, %c128] : memref<32x384xf32, #tpu.memory_space<vmem>>, vector<32x32xf32>
    %cst_16 = arith.constant dense<0.000000e+00> : vector<8x32xf32>
    %75 = tpu.matmul %73, %74, %cst_16 {dimension_numbers = #tpu.dot_dimension_numbers<[1], [0], [0], [1], [0, 0, 1, 1], [], []>} : vector<8x32xf32>, vector<32x32xf32>, vector<8x32xf32> -> vector<8x32xf32>
    %76 = vector.broadcast %4 : vector<1x32xf32> to vector<8x32xf32>
    %77 = arith.addf %75, %76 : vector<8x32xf32>
    %cst_17 = arith.constant 0.000000e+00 : f32
    %78 = vector.broadcast %cst_17 : f32 to vector<8x32xf32>
    %79 = arith.maximumf %77, %78 : vector<8x32xf32>
    %cst_18 = arith.constant dense<0.000000e+00> : vector<32xf32>
    %80 = vector.multi_reduction <add>, %79, %cst_18 [0] : vector<8x32xf32> to vector<32xf32>
    %81 = vector.shape_cast %80 : vector<32xf32> to vector<1x32xf32>
    %cst_19 = arith.constant 1.250000e-01 : f32
    %82 = vector.broadcast %cst_19 : f32 to vector<1x32xf32>
    %83 = arith.mulf %81, %82 : vector<1x32xf32>
    %84 = arith.mulf %79, %79 : vector<8x32xf32>
    %cst_20 = arith.constant dense<0.000000e+00> : vector<32xf32>
    %85 = vector.multi_reduction <add>, %84, %cst_20 [0] : vector<8x32xf32> to vector<32xf32>
    %86 = vector.shape_cast %85 : vector<32xf32> to vector<1x32xf32>
    %cst_21 = arith.constant 1.250000e-01 : f32
    %87 = vector.broadcast %cst_21 : f32 to vector<1x32xf32>
    %88 = arith.mulf %86, %87 : vector<1x32xf32>
    %89 = arith.mulf %83, %83 : vector<1x32xf32>
    %90 = arith.subf %88, %89 : vector<1x32xf32>
    %cst_22 = arith.constant 0.000000e+00 : f32
    %91 = vector.broadcast %cst_22 : f32 to vector<1x32xf32>
    %92 = arith.maximumf %90, %91 : vector<1x32xf32>
    %93 = vector.broadcast %83 : vector<1x32xf32> to vector<8x32xf32>
    %94 = arith.subf %79, %93 : vector<8x32xf32>
    %cst_23 = arith.constant 9.99999974E-6 : f32
    %95 = vector.broadcast %cst_23 : f32 to vector<1x32xf32>
    %96 = arith.addf %92, %95 : vector<1x32xf32>
    %97 = math.rsqrt %96 : vector<1x32xf32>
    %98 = vector.broadcast %97 : vector<1x32xf32> to vector<8x32xf32>
    %99 = arith.mulf %94, %98 : vector<8x32xf32>
    %100 = arith.mulf %21, %99 : vector<8x32xf32>
    %101 = arith.addf %100, %22 : vector<8x32xf32>
    %c0_24 = arith.constant 0 : index
    %c256 = arith.constant 256 : index
    %102 = vector.load %arg3[%c0_24, %c256] : memref<32x384xf32, #tpu.memory_space<vmem>>, vector<32x128xf32>
    %cst_25 = arith.constant dense<0.000000e+00> : vector<8x128xf32>
    %103 = tpu.matmul %101, %102, %cst_25 {dimension_numbers = #tpu.dot_dimension_numbers<[1], [0], [0], [1], [0, 0, 1, 1], [], []>} : vector<8x32xf32>, vector<32x128xf32>, vector<8x128xf32> -> vector<8x128xf32>
    %104 = vector.broadcast %6 : vector<1x128xf32> to vector<8x128xf32>
    %105 = arith.addf %103, %104 : vector<8x128xf32>
    %c0_26 = arith.constant 0 : index
    %c0_27 = arith.constant 0 : index
    %106 = vector.load %arg4[%c0_26, %c0_27] : memref<8x128xf32, #tpu.memory_space<vmem>>, vector<8x128xf32>
    tpu.vector_store %arg4[%c0_26, %c0_27], %105 {strides = array<i32>} : memref<8x128xf32, #tpu.memory_space<vmem>>, vector<8x128xf32>,
    return
  }
}

</mosaic_0001>

<bundles_post_ra>
// kernel: mlp_cnf_bn_forward.1
= control target key start
LH: loop header
LB: loop body
LE: loop exit
PB: predicated region body
PF: predicated region fallthrough
CT: control target
= control target key end

     0   :  { %9 = vsyncpa [#allocation3], 0  ;;  %s323_s18 = smov [#allocation2]   ;;  %s324_s20 = smov 384   ;;  %s407_s0 = inlined_call_operand.vmem [shape: f32[8,4], index: 0, kind: input, shape index: {}]   ;;  %s408_s1 = inlined_call_operand.vmem [shape: f32[8,1], index: 1, kind: input, shape index: {}]   ;;  %s409_s2 = inlined_call_operand.vmem [shape: f32[8,128], index: 2, kind: input, shape index: {}]   ;;  %s410_s3 = inlined_call_operand.hbm [shape: f32[32,384], index: 3, kind: input, shape index: {}]   ;;  %s411_s4 = inlined_call_operand.vmem [shape: f32[8,128], index: 4, kind: output, shape index: {}]  }
   0x1   :  { %s20_s17 = sshll.u32 %s410_s3, 4  ;;  %s22_s19 = sshll.u32 %s323_s18, 4  ;;  %s21_s17 = int_to_ptr.hbm [resolvable:$true] %s20_s17  ;;  %s23_s19 = int_to_ptr.vmem [resolvable:$true] %s22_s19 }
   0x2   :  { %s325_s21 = smov 24  }
   0x3   :  { %28 = dma.hbm_to_vmem [thread:$0]  %s21_s17, 1536, %s23_s19, [#allocation3], %s324_s20, %s324_s20, %s325_s21  }
   0x4   :  { %321 = dma.done.wait [#allocation3], 1536  }
   0x5   :  { %322 = vsyncadd [#allocation3], 4294965760  ;;  %v326_v0 = vmov 0   ;;  %v327_v1 = vmov 2   ;;  %v77_v2 = vld [vmem:[%s407_s0] sm:$0xff]  ;;  %v328_v6 = vmov 1  }
   0x6   :  { %288 = vset.pattern.permute.xlu1 %v326_v0  ;;  %290 = vset.pattern.permute.xlu2 %v327_v1  ;;  %v34_v3 = vld [vmem:[%s408_s1] sm:$0xff]  ;;  %v329_v7 = vmov 3   ;;  %s330_s0 = smov 96   ;;  %s331_s1 = smov 64   ;;  %v51_v11 = vld [vmem:[#allocation2 + $0x48] sm:$0xff]  ;;  %v50_v12 = vld [vmem:[#allocation2 + $0x30] sm:$0xff] }
   0x7   :  { %287 = vset.pattern.permute.xlu0 %v326_v0  ;;  %80 = vperm.xlu1 %288, %v77_v2   ;;  %v370_v4 = vld [vmem:[%s409_s2] sm:$0xff]  ;;  %v49_v13 = vld [vmem:[#allocation2 + $0x18] sm:$0xff]  ;;  %vm53_vm0 = vcmask 261120   ;;  %vm124_vm1 = vcmask 785920   ;;  %s332_s2 = smov 32  }
   0x8   :  { %102 = vperm.xlu2 %290, %v77_v2   ;;  %37 = vperm.xlu0 %287, %v34_v3   ;;  %v373_v5 = vperm.slane %v370_v4, 0  ;;  %v105_v8 = vperm.slane %v370_v4, 6  ;;  %v48_v14 = vld [vmem:[#allocation2] sm:$0xff]  ;;  %v83_v15 = vperm.slane %v370_v4, 4  ;;  %v116_v19 = vperm.slane %v370_v4, 7 }
   0x9   :  { %69 = vmatpush.msra.mxu0 %v51_v11  ;;  %v94_v21 = vperm.slane %v370_v4, 5  ;;  %v52_v52 = vperm.slane %v370_v4, 1  ;;  %v169_v11 = vld [vmem:[#allocation2 + $0x20] sm:$0xff] }
   0xb   :  { %70 = vmatpush.msra.mxu0 %v50_v12  ;;  %v168_v12 = vld [vmem:[#allocation2 + $0x8] sm:$0xff] }
   0xd   :  { %71 = vmatpush.msra.mxu0 %v49_v13 }
   0xf   :  { %289 = vset.pattern.permute.xlu1 %v328_v6  ;;  %72 = vmatpush.msra.mxu0 %v48_v14 }
  0x10   :  { %291 = vset.pattern.permute.xlu2 %v329_v7  ;;  %91 = vperm.xlu1 %289, %v77_v2  }
  0x11   :  { %113 = vperm.xlu2 %291, %v77_v2   ;;  %43 = vrot.lane.b32.xlu0 %v373_v5, %s330_s0 }
  0x12   :  { %292 = vset.pattern.permute.xlu0 %v329_v7 }
  0x62   :  { %v103_v9 = vpop.permute.xlu2 %102 }
  0x63   :  { %v106_v10 = vmul.f32 %v105_v8, %v103_v9  ;;  %v171_v9 = vld [vmem:[#allocation2 + $0x50] sm:$0xff] }
  0x64   :  { %190 = vmatpush.msra.mxu1 %v171_v9 }
  0x65   :  { %108 = vrot.lane.b32.xlu2 %v106_v10, %s331_s1  ;;  %v170_v10 = vld [vmem:[#allocation2 + $0x38] sm:$0xff] }
  0x66   :  { %191 = vmatpush.msra.mxu1 %v170_v10 }
  0x68   :  { %192 = vmatpush.msra.mxu1 %v169_v11 }
  0x6a   :  { %193 = vmatpush.msra.mxu1 %v168_v12 }
  0x6b   :  { %v114_v20 = vpop.permute.xlu2 %113 }
  0x6c   :  { %v117_v22 = vmul.f32 %v116_v19, %v114_v20 }
  0x79   :  { %v81_v16 = vpop.permute.xlu1 %80 }
  0x7a   :  { %v84_v17 = vmul.f32 %v83_v15, %v81_v16  ;;  %v38_v18 = vpop.permute.xlu0 %37 }
  0x7b   :  { %v41_v23 = vmul.f32 %v373_v5, %v38_v18 }
  0x7c   :  { %86 = vrot.lane.b32.xlu0 %v84_v17, %s331_s1 }
  0x82   :  { %v92_v24 = vpop.permute.xlu1 %91 }
  0x83   :  { %v95_v25 = vmul.f32 %v94_v21, %v92_v24  ;;  %v44_v26 = vpop.permute.xlu0 %43 }
  0x84   :  { %119 = vrot.lane.b32.xlu0 %v117_v22, %s331_s1  ;;  %v46_v27 = vadd.f32 %v44_v26, %v41_v23 }
  0x85   :  { %97 = vrot.lane.b32.xlu1 %v95_v25, %s331_s1 }
  0x86   :  { %v47_v28 = vmax.f32 %v46_v27, 0.0 }
  0x88   :  { %274 = vmatmul.msk.f32.vlgmr.msra.gmra.mxu0 %vm53_vm0, %v47_v28 }
  0x8c   :  { %172 = vrot.lane.b32.xlu0 %v373_v5, %s332_s2 }
  0xbf   :  { %v109_v33 = vpop.permute.xlu2 %108 }
  0xee   :  { %v87_v29 = vpop.permute.xlu0 %86 }
  0xef   :  { %v89_v30 = vadd.f32 %v87_v29, %v373_v5 }
  0xf6   :  { %v120_v34 = vpop.permute.xlu0 %119 }
  0xf7   :  { %v98_v31 = vpop.permute.xlu1 %97 }
  0xf8   :  { %v100_v32 = vadd.f32 %v98_v31, %v89_v30 }
  0xfa   :  { %v111_v35 = vadd.f32 %v109_v33, %v100_v32 }
  0xfc   :  { %v122_v36 = vadd.f32 %v120_v34, %v111_v35 }
  0xfe   :  { %v123_v37 = vmax.f32 %v122_v36, 0.0  ;;  %v173_v16 = vpop.permute.xlu0 %172 }
 0x100   :  { %v125_v38 = vsel %vm124_vm1, %v123_v37, 0.0  ;;  %v133_v39 = vmul.f32 %v123_v37, %v123_v37 }
 0x101   :  { %v126_v40 = vrot.slane %v125_v38, 4 }
 0x102   :  { %v134_v41 = vsel %vm124_vm1, %v133_v39, 0.0 }
 0x103   :  { %v127_v42 = vadd.f32 %v126_v40, %v125_v38  ;;  %v135_v43 = vrot.slane %v134_v41, 4 }
 0x105   :  { %v128_v44 = vrot.slane %v127_v42, 2  ;;  %v136_v45 = vadd.f32 %v135_v43, %v134_v41  ;;  %v74_v53 = vpop.f32.mrf.mxu0 }
 0x106   :  { %v389_v56 = vadd.f32 %v74_v53, %v52_v52  ;;  %v239_v52 = vld [vmem:[#allocation2 + $0x28] sm:$0xff]  ;;  %v238_v53 = vld [vmem:[#allocation2 + $0x10] sm:$0xff] }
 0x107   :  { %v129_v46 = vadd.f32 %v128_v44, %v127_v42  ;;  %v137_v47 = vrot.slane %v136_v45, 2 }
 0x108   :  { %164 = vrot.lane.b32.xlu2 %v389_v56, %s330_s0 }
 0x109   :  { %v130_v48 = vrot.slane %v129_v46, 1  ;;  %v138_v49 = vadd.f32 %v137_v47, %v136_v45 }
 0x10b   :  { %v131_v50 = vadd.f32 %v130_v48, %v129_v46  ;;  %v139_v51 = vrot.slane %v138_v49, 1 }
 0x10d   :  { %v132_v54 = vmul.f32 0.125, %v131_v50  ;;  %v140_v55 = vadd.f32 %v139_v51, %v138_v49  ;;  %v241_v50 = vld [vmem:[#allocation2 + $0x58] sm:$0xff]  ;;  %v240_v51 = vld [vmem:[#allocation2 + $0x40] sm:$0xff] }
 0x10e   :  { %260 = vmatpush.msra.mxu2 %v241_v50 }
 0x10f   :  { %v141_v57 = vmul.f32 0.125, %v140_v55  ;;  %v142_v58 = vmul.f32 %v132_v54, %v132_v54  ;;  %v145_v6 = vsub.f32 %v123_v37, %v132_v54 }
 0x110   :  { %261 = vmatpush.msra.mxu2 %v240_v51 }
 0x111   :  { %v143_v59 = vsub.f32 %v141_v57, %v142_v58 }
 0x112   :  { %262 = vmatpush.msra.mxu2 %v239_v52 }
 0x113   :  { %v144_v60 = vmax.f32 %v143_v59, 0.0  ;;  %v242_v59 = vperm.slane %v370_v4, 2 }
 0x114   :  { %263 = vmatpush.msra.mxu2 %v238_v53 }
 0x115   :  { %v146_v61 = vadd.f32 1e-05, %v144_v60 }
 0x117   :  { %293 = vrsqrt.f32 %v146_v61  ;;  %vm153_vm3 = vweird.f32 %v146_v61 }
 0x11d   :  { %v294_v62 = vpop.eup %293 }
 0x11e   :  { %v148_v63 = vmul.f32 %v294_v62, %v146_v61  ;;  %vm154_vm2 = vweird.f32 %v294_v62 }
 0x11f   :  { %vm155_vm4 = vmor %vm153_vm3, %vm154_vm2 }
 0x120   :  { %v149_v0 = vmul.f32 %v294_v62, %v148_v63 }
 0x122   :  { %v150_v1 = vmul.f32 0.5, %v149_v0 }
 0x124   :  { %v151_v2 = vsub.f32 1.5, %v150_v1 }
 0x126   :  { %v152_v3 = vmul.f32 %v294_v62, %v151_v2 }
 0x128   :  { %v156_v7 = vsel %vm155_vm4, %v294_v62, %v152_v3 }
 0x129   :  { %v157_v8 = vmul.f32 %v156_v7, %v145_v6 }
 0x12b   :  { %159 = vrot.lane.b32.xlu1 %v157_v8, %s331_s1 }
 0x162   :  { %v165_v14 = vpop.permute.xlu2 %164 }
 0x19d   :  { %v160_v13 = vpop.permute.xlu1 %159 }
 0x19e   :  { %v162_v5 = vmul.f32 %v160_v13, %v389_v56 }
 0x1a0   :  { %v167_v15 = vadd.f32 %v165_v14, %v162_v5 }
 0x1a2   :  { %275 = vmatmul.msk.f32.vlgmr.msra.gmra.mxu1 %vm53_vm0, %v167_v15 }
 0x21f   :  { %v195_v17 = vpop.f32.mrf.mxu1 }
 0x220   :  { %v196_v18 = vadd.f32 %v195_v17, %v173_v16 }
 0x222   :  { %v198_v19 = vmax.f32 %v196_v18, 0.0 }
 0x224   :  { %v199_v20 = vsel %vm53_vm0, %v198_v19, 0.0  ;;  %v207_v21 = vmul.f32 %v198_v19, %v198_v19 }
 0x225   :  { %v200_v22 = vrot.slane %v199_v20, 4 }
 0x226   :  { %v208_v23 = vsel %vm53_vm0, %v207_v21, 0.0 }
 0x227   :  { %v201_v24 = vadd.f32 %v200_v22, %v199_v20  ;;  %v209_v25 = vrot.slane %v208_v23, 4 }
 0x229   :  { %v202_v26 = vrot.slane %v201_v24, 2  ;;  %v210_v27 = vadd.f32 %v209_v25, %v208_v23 }
 0x22b   :  { %v203_v28 = vadd.f32 %v202_v26, %v201_v24  ;;  %v211_v29 = vrot.slane %v210_v27, 2 }
 0x22d   :  { %v204_v30 = vrot.slane %v203_v28, 1  ;;  %v212_v31 = vadd.f32 %v211_v29, %v210_v27 }
 0x22f   :  { %v205_v32 = vadd.f32 %v204_v30, %v203_v28  ;;  %v213_v33 = vrot.slane %v212_v31, 1 }
 0x231   :  { %v206_v34 = vmul.f32 0.125, %v205_v32  ;;  %v214_v35 = vadd.f32 %v213_v33, %v212_v31 }
 0x233   :  { %v215_v36 = vmul.f32 0.125, %v214_v35  ;;  %v216_v37 = vmul.f32 %v206_v34, %v206_v34  ;;  %v219_v47 = vsub.f32 %v198_v19, %v206_v34 }
 0x235   :  { %v217_v38 = vsub.f32 %v215_v36, %v216_v37 }
 0x237   :  { %v218_v39 = vmax.f32 %v217_v38, 0.0 }
 0x239   :  { %v220_v40 = vadd.f32 1e-05, %v218_v39 }
 0x23b   :  { %295 = vrsqrt.f32 %v220_v40  ;;  %vm227_vm6 = vweird.f32 %v220_v40 }
 0x241   :  { %v296_v41 = vpop.eup %295 }
 0x242   :  { %v222_v42 = vmul.f32 %v296_v41, %v220_v40  ;;  %vm228_vm5 = vweird.f32 %v296_v41 }
 0x243   :  { %vm229_vm7 = vmor %vm227_vm6, %vm228_vm5 }
 0x244   :  { %v223_v43 = vmul.f32 %v296_v41, %v222_v42 }
 0x246   :  { %v224_v44 = vmul.f32 0.5, %v223_v43 }
 0x248   :  { %v225_v45 = vsub.f32 1.5, %v224_v44 }
 0x24a   :  { %v226_v46 = vmul.f32 %v296_v41, %v225_v45 }
 0x24c   :  { %v230_v48 = vsel %vm229_vm7, %v296_v41, %v226_v46 }
 0x24d   :  { %v231_v49 = vmul.f32 %v230_v48, %v219_v47 }
 0x24f   :  { %233 = vrot.lane.b32.xlu1 %v231_v49, %s331_s1 }
 0x2c1   :  { %v234_v54 = vpop.permute.xlu1 %233 }
 0x2c2   :  { %v236_v55 = vmul.f32 %v234_v54, %v389_v56 }
 0x2c4   :  { %v237_v57 = vadd.f32 %v236_v55, %v165_v14 }
 0x2c6   :  { %244 = vrot.lane.b32.xlu2 %v237_v57, %s331_s1 }
 0x320   :  { %v245_v58 = vpop.permute.xlu2 %244 }
 0x321   :  { %276 = vmatmul.msk.f32.vlgmr.msra.gmra.mxu2 %vm53_vm0, %v245_v58 }
 0x3a4   :  { %v265_v60 = vpop.f32.mrf.mxu2 }
 0x3a5   :  { %v266_v61 = vadd.f32 %v265_v60, %v242_v59 }
 0x3a7   :  { %268 = vst [vmem:[%s411_s4] sm:$0xff] %v266_v61 }
 0x3a8   :  { %273 = vsyncpa [#allocation3], 1 }

</bundles_post_ra>
